<compile_context>
chip_gen: v5e
topology: v5e:2x2
jax: 0.10.0
libtpu: 0.0.40
codegen_flags: <defaults>
</compile_context>

<pallas_src>
import functools

import jax
import jax.numpy as jnp
import numpy as np
from jax.experimental import pallas as pl
from jax.experimental.pallas import tpu as pltpu

T1 = 0.3
T2 = 1.0
SMOOTHING = 0.05


def _bi_tempered_kernel(labels_ref, logits_ref, out_ref, *, t1, smoothing,
                        n_rows, tile_n, apply_mask):
    # logits_ref: (TN, C) float, labels_ref: (TN, 1) int32, out_ref: (1, 1, 128) f32
    x = logits_ref[...].astype(jnp.float32)
    labels = labels_ref[...]                      # (TN, 1) int32
    tn, c = x.shape

    one_m_t = 1.0 - t1                            # 0.7
    two_m_t = 2.0 - t1                            # 1.7

    # After label smoothing the one-hot tensor takes exactly two values:
    #   on  = 1 - smoothing            (at the label column)
    #   off = smoothing / (c - 1)      (elsewhere)
    on = 1.0 - smoothing
    off = smoothing / (c - 1)

    def _log_t_const(u):                          # python-float log_t (t1 != 1)
        return (u ** one_m_t - 1.0) / one_m_t

    # Data-independent loss terms -> one trace-time constant. Includes the
    # "+ sum_c(onehot)/(1-t1) == + 1/(1-t1)" piece of the -onehot*log_t(probs) term.
    const_term = (on * _log_t_const(on + 1e-10)
                  + (c - 1) * off * _log_t_const(off + 1e-10)
                  - (on ** two_m_t + (c - 1) * off ** two_m_t) / two_m_t
                  + 1.0 / one_m_t)

    # Stable softmax pieces (t2 == 1.0 -> tempered_softmax == softmax).
    m = jnp.max(x, axis=-1, keepdims=True)
    xs = x - m
    e = jnp.exp(xs)
    denom = jnp.sum(e, axis=-1, keepdims=True)
    probs = e / denom                                   # softmax
    p07 = jnp.exp(one_m_t * (xs - jnp.log(denom)))      # probs ** (1 - t1)
    p17 = p07 * probs                                   # probs ** (2 - t1), no extra exp

    # sum_c onehot * probs**(1-t1) / (1-t1) as ONE weighted masked reduce.
    col = jax.lax.broadcasted_iota(jnp.int32, (tn, c), 1)
    w = jnp.where(col == labels, on / one_m_t, off / one_m_t) * p07
    sum_w = jnp.sum(w, axis=-1, keepdims=True)          # (TN, 1)
    s17 = jnp.sum(p17, axis=-1, keepdims=True)          # (TN, 1)

    loss_rows = const_term - sum_w + s17 * (1.0 / two_m_t)   # (TN, 1)

    if apply_mask:
        # Ragged tail block: rows beyond the true batch size hold undefined
        # (OOB-read) data -> zero their contribution before the sublane reduce.
        row = (pl.program_id(0) * tile_n
               + jax.lax.broadcasted_iota(jnp.int32, (tn, 1), 0))
        loss_rows = jnp.where(row < n_rows, loss_rows, 0.0)

    partial = jnp.sum(loss_rows, axis=0, keepdims=True)      # (1, 1)
    out_ref[...] = jnp.broadcast_to(partial.reshape(1, 1, 1), (1, 1, 128))


def _pick_tile_n(n, c, itemsize):
    # Target a ~2 MiB logits block (multiple of 8 rows, <= 2048 rows),
    # capped at the (8-rounded) batch size so small inputs aren't over-tiled.
    target_bytes = 2 << 20
    t = (target_bytes // max(1, c * itemsize)) // 8 * 8
    t = max(8, min(2048, t))
    n8 = ((n + 7) // 8) * 8
    return max(8, min(t, n8))


def bi_tempered_logistic_loss_pallas(logits, labels, *, t1=T1, t2=T2,
                                     smoothing=SMOOTHING, tile_n=None):
    """logits: (N, C) float; labels: (N,) int class indices. Returns scalar mean loss."""
    assert t2 == 1.0, "only the module's t2=1.0 configuration is supported"
    n, c = logits.shape
    if tile_n is None:
        tile_n = _pick_tile_n(n, c, jnp.dtype(logits.dtype).itemsize)

    num_blocks = pl.cdiv(n, tile_n)
    labels2d = labels.reshape(n, 1).astype(jnp.int32)

    kernel = functools.partial(_bi_tempered_kernel,
                               t1=float(t1), smoothing=float(smoothing),
                               n_rows=n, tile_n=tile_n,
                               apply_mask=(n % tile_n != 0))

    partials = pl.pallas_call(
        kernel,
        out_shape=jax.ShapeDtypeStruct((num_blocks, 1, 128), jnp.float32),
        grid_spec=pltpu.PrefetchScalarGridSpec(
            num_scalar_prefetch=0,
            grid=(num_blocks,),
            in_specs=[
                pl.BlockSpec((tile_n, 1), lambda i: (i, 0)),   # labels
                pl.BlockSpec((tile_n, c), lambda i: (i, 0)),   # logits
            ],
            out_specs=pl.BlockSpec((1, 1, 128), lambda i: (i, 0, 0)),
        ),
        compiler_params=pltpu.CompilerParams(
            dimension_semantics=("parallel",),
            vmem_limit_bytes=32 * 1024 * 1024),
    )(labels2d, logits)

    # reduction='none' in bi_tempered_logistic_loss, then .mean() in forward.
    # Every lane of each partial row holds the same value -> read lane 0 only,
    # divide by the TRUE batch size.
    return jnp.sum(partials[:, 0, 0]) / n


def _reference(logits, labels, t1=T1, smoothing=SMOOTHING):
    # pure-JAX reference mirroring the PyTorch code (t2 == 1.0)
    logits = logits.astype(jnp.float32)
    n, c = logits.shape
    onehot = jax.nn.one_hot(labels, c, dtype=jnp.float32)
    onehot = (1.0 - smoothing * c / (c - 1)) * onehot + smoothing / (c - 1)
    probs = jax.nn.softmax(logits, axis=-1)
    log_t = lambda u: (jnp.power(u, 1.0 - t1) - 1.0) / (1.0 - t1)
    loss = (onehot * log_t(onehot + 1e-10)
            - onehot * log_t(probs)
            - jnp.power(onehot, 2.0 - t1) / (2.0 - t1)
            + jnp.power(probs, 2.0 - t1) / (2.0 - t1))
    return jnp.mean(jnp.sum(loss, axis=-1))


if __name__ == "__main__":
    key = jax.random.PRNGKey(0)
    k1, k2 = jax.random.split(key)

    # Case 1: batch divisible by the chosen tile (no masking path).
    N, C = 16, 64
    logits = jax.random.normal(k1, (N, C), dtype=jnp.float32)
    labels = jax.random.randint(k2, (N,), 0, C, dtype=jnp.int32)

    out = jax.block_until_ready(bi_tempered_logistic_loss_pallas(logits, labels))
    ref = jax.block_until_ready(_reference(logits, labels))
    np.testing.assert_allclose(np.asarray(out), np.asarray(ref),
                               rtol=1e-5, atol=1e-5)

    # Case 2: batch NOT divisible by 8 -> single ragged block, in-kernel mask.
    N2 = 13
    out2 = jax.block_until_ready(bi_tempered_logistic_loss_pallas(logits[:N2], labels[:N2]))
    ref2 = jax.block_until_ready(_reference(logits[:N2], labels[:N2]))
    np.testing.assert_allclose(np.asarray(out2), np.asarray(ref2),
                               rtol=1e-5, atol=1e-5)

    # Case 3: multiple blocks with a ragged tail block (forced small tile).
    k3, k4 = jax.random.split(k1)
    N3, C3 = 37, 96
    logits3 = jax.random.normal(k3, (N3, C3), dtype=jnp.float32)
    labels3 = jax.random.randint(k4, (N3,), 0, C3, dtype=jnp.int32)
    out3 = jax.block_until_ready(
        bi_tempered_logistic_loss_pallas(logits3, labels3, tile_n=16))
    ref3 = jax.block_until_ready(_reference(logits3, labels3))
    np.testing.assert_allclose(np.asarray(out3), np.asarray(ref3),
                               rtol=1e-5, atol=1e-5)

    print("KERNEL_OK")
</pallas_src>

<mosaic_0001>
module attributes {stable_mosaic.version = 11 : i64} {
  func.func @_bi_tempered_kernel(%arg0: i32, %arg1: memref<16x1xi32, #tpu.memory_space<vmem>>, %arg2: memref<16x64xf32, #tpu.memory_space<vmem>>, %arg3: memref<1x1x128xf32, #tpu.memory_space<vmem>>) attributes {dimension_semantics = [#tpu.dimension_semantics<parallel>], iteration_bounds = array<i64: 1>, scalar_prefetch = 0 : i64, scratch_operands = 0 : i64, tpu.core_type = #tpu.core_type<tc>, window_params = [{transform_indices = @transform_0, window_bounds = array<i64: 16, 1>}, {transform_indices = @transform_1, window_bounds = array<i64: 16, 64>}, {transform_indices = @transform_2, window_bounds = array<i64: 1, 1, 128>}]} {
    %c0 = arith.constant 0 : index
    %c0_0 = arith.constant 0 : index
    %0 = vector.load %arg2[%c0, %c0_0] : memref<16x64xf32, #tpu.memory_space<vmem>>, vector<16x64xf32>
    %c0_1 = arith.constant 0 : index
    %c0_2 = arith.constant 0 : index
    %1 = vector.load %arg1[%c0_1, %c0_2] : memref<16x1xi32, #tpu.memory_space<vmem>>, vector<16x1xi32>
    %cst = arith.constant dense<0xFF800000> : vector<16xf32>
    %2 = vector.multi_reduction <maximumf>, %0, %cst [1] : vector<16x64xf32> to vector<16xf32>
    %3 = vector.shape_cast %2 : vector<16xf32> to vector<16x1xf32>
    %4 = vector.broadcast %3 : vector<16x1xf32> to vector<16x64xf32>
    %5 = arith.subf %0, %4 : vector<16x64xf32>
    %6 = math.exp %5 : vector<16x64xf32>
    %cst_3 = arith.constant dense<0.000000e+00> : vector<16xf32>
    %7 = vector.multi_reduction <add>, %6, %cst_3 [1] : vector<16x64xf32> to vector<16xf32>
    %8 = vector.shape_cast %7 : vector<16xf32> to vector<16x1xf32>
    %9 = vector.broadcast %8 : vector<16x1xf32> to vector<16x64xf32>
    %10 = arith.divf %6, %9 : vector<16x64xf32>
    %11 = math.log %8 : vector<16x1xf32>
    %12 = vector.broadcast %11 : vector<16x1xf32> to vector<16x64xf32>
    %13 = arith.subf %5, %12 : vector<16x64xf32>
    %cst_4 = arith.constant 0.699999988 : f32
    %14 = vector.broadcast %cst_4 : f32 to vector<16x64xf32>
    %15 = arith.mulf %14, %13 : vector<16x64xf32>
    %16 = math.exp %15 : vector<16x64xf32>
    %17 = arith.mulf %16, %10 : vector<16x64xf32>
    %18 = tpu.iota {dimensions = array<i32: 1>} : vector<16x64xi32>
    %19 = vector.broadcast %1 : vector<16x1xi32> to vector<16x64xi32>
    %20 = arith.cmpi eq, %18, %19 : vector<16x64xi32>
    %cst_5 = arith.constant 1.35714281 : f32
    %cst_6 = arith.constant 0.00113378686 : f32
    %21 = vector.broadcast %cst_5 : f32 to vector<16x64xf32>
    %22 = vector.broadcast %cst_6 : f32 to vector<16x64xf32>
    %23 = arith.select %20, %21, %22 : vector<16x64xi1>, vector<16x64xf32>
    %24 = arith.mulf %23, %16 : vector<16x64xf32>
    %cst_7 = arith.constant dense<0.000000e+00> : vector<16xf32>
    %25 = vector.multi_reduction <add>, %24, %cst_7 [1] : vector<16x64xf32> to vector<16xf32>
    %26 = vector.shape_cast %25 : vector<16xf32> to vector<16x1xf32>
    %cst_8 = arith.constant dense<0.000000e+00> : vector<16xf32>
    %27 = vector.multi_reduction <add>, %17, %cst_8 [1] : vector<16x64xf32> to vector<16xf32>
    %28 = vector.shape_cast %27 : vector<16xf32> to vector<16x1xf32>
    %cst_9 = arith.constant 0.77044779 : f32
    %29 = vector.broadcast %cst_9 : f32 to vector<16x1xf32>
    %30 = arith.subf %29, %26 : vector<16x1xf32>
    %cst_10 = arith.constant 0.588235319 : f32
    %31 = vector.broadcast %cst_10 : f32 to vector<16x1xf32>
    %32 = arith.mulf %28, %31 : vector<16x1xf32>
    %33 = arith.addf %30, %32 : vector<16x1xf32>
    %cst_11 = arith.constant dense<0.000000e+00> : vector<1xf32>
    %34 = vector.multi_reduction <add>, %33, %cst_11 [0] : vector<16x1xf32> to vector<1xf32>
    %35 = vector.shape_cast %34 : vector<1xf32> to vector<1x1xf32>
    %36 = vector.shape_cast %35 : vector<1x1xf32> to vector<1x1x1xf32>
    %37 = vector.shape_cast %36 : vector<1x1x1xf32> to vector<1x1x1xf32>
    %38 = vector.broadcast %37 : vector<1x1x1xf32> to vector<1x1x128xf32>
    %c0_12 = arith.constant 0 : index
    %c0_13 = arith.constant 0 : index
    %c0_14 = arith.constant 0 : index
    %39 = vector.load %arg3[%c0_12, %c0_13, %c0_14] : memref<1x1x128xf32, #tpu.memory_space<vmem>>, vector<1x1x128xf32>
    tpu.vector_store %arg3[%c0_12, %c0_13, %c0_14], %38 {strides = array<i32>} : memref<1x1x128xf32, #tpu.memory_space<vmem>>, vector<1x1x128xf32>,
    return
  }
  func.func @transform_0(%arg0: i32) -> (i32, i32) {
    %c0_i32 = arith.constant 0 : i32
    %c0_i32_0 = arith.constant 0 : i32
    return %arg0, %c0_i32 : i32, i32
  }
  func.func @transform_1(%arg0: i32) -> (i32, i32) {
    %c0_i32 = arith.constant 0 : i32
    %c0_i32_0 = arith.constant 0 : i32
    return %arg0, %c0_i32 : i32, i32
  }
  func.func @transform_2(%arg0: i32) -> (i32, i32, i32) {
    %c0_i32 = arith.constant 0 : i32
    %c0_i32_0 = arith.constant 0 : i32
    %c0_i32_1 = arith.constant 0 : i32
    return %arg0, %c0_i32, %c0_i32_0 : i32, i32, i32
  }
}

</mosaic_0001>

<bundles_post_ra>
// kernel: tpu_custom_call.1
= control target key start
LH: loop header
LB: loop body
LE: loop exit
PB: predicated region body
PF: predicated region fallthrough
CT: control target
= control target key end

     0   :  { %vm16_vm0 = vcmask 523264   ;;  %s227_s0 = inlined_call_operand.vmem [shape: s32[16,1], index: 0, kind: input, shape index: {}]   ;;  %s228_s1 = inlined_call_operand.vmem [shape: f32[16,64], index: 1, kind: input, shape index: {}]   ;;  %s229_s2 = inlined_call_operand.hbm [shape: f32[1,1,128], index: 2, kind: output, shape index: {}]  }
   0x1   :  { %v12_v0 = vld [vmem:[%s228_s1] sm:$0xff] }
   0x2   :  { %7 = vsyncpa [#allocation3], 0  ;;  %v17_v1 = vsel %vm16_vm0, %v12_v0, -inf  ;;  %v13_v2 = vld [vmem:[%s228_s1 + $0x8] sm:$0xff]  ;;  %v14_v4 = vld [vmem:[%s227_s0] sm:$0xff]  ;;  %v182_v5 = vmov 0   ;;  %v79_v24 = vlaneseq }
   0x3   :  { %18 = vmax.xlane.f32.xlu0 %v17_v1  ;;  %v20_v3 = vsel %vm16_vm0, %v13_v2, -inf  ;;  %138 = vset.pattern.permute.xlu2 %v182_v5  ;;  %v15_v6 = vld [vmem:[%s227_s0 + $0x8] sm:$0xff]  ;;  %v183_v44 = vmov 0.0011337869   ;;  %s184_s0 = smov [#allocation2]   ;;  %s126_s19 = sshll.u32 %s229_s2, 4  ;;  %s127_s19 = int_to_ptr.hbm [resolvable:$true] %s126_s19 }
   0x4   :  { %139 = vset.pattern.permute.xlu0 %v182_v5  ;;  %82 = vperm.xlu2 %138, %v14_v4   ;;  %v80_v29 = vand.u32 127, %v79_v24  ;;  %s124_s1 = sshll.u32 %s184_s0, 4  ;;  %s125_s1 = int_to_ptr.vmem [resolvable:$true] %s124_s1 }
   0xb   :  { %21 = vmax.xlane.f32.xlu0 %v20_v3 }
   0xc   :  { %85 = vperm.xlu2 %138, %v15_v6  }
  0x5e   :  { %v83_v33 = vpop.permute.xlu2 %82 }
  0x5f   :  { %vm87_vm4 = vcmp.eq.s32.totalorder %v80_v29, %v83_v33 }
  0x60   :  { %v89_v45 = vsel %vm87_vm4, 1.3571428, %v183_v44 }
  0x66   :  { %v86_v56 = vpop.permute.xlu2 %85 }
  0x67   :  { %vm88_vm10 = vcmp.eq.s32.totalorder %v80_v29, %v86_v56 }
  0x68   :  { %v90_v63 = vsel %vm88_vm10, 1.3571428, %v183_v44 }
  0x76   :  { %v19_v7 = vpop.xlane.xlu0 %18 }
  0x77   :  { %v23_v8 = vsub.f32 %v12_v0, %v19_v7 }
  0x79   :  { %v25_v9 = vmul.f32 1.442695, %v23_v8 }
  0x7b   :  { %140 = vpow2.f32 %v25_v9 }
  0x7e   :  { %v22_v10 = vpop.xlane.xlu0 %21 }
  0x7f   :  { %v24_v11 = vsub.f32 %v13_v2, %v22_v10 }
  0x81   :  { %v141_v12 = vpop.eup %140  ;;  %v27_v13 = vmul.f32 1.442695, %v24_v11 }
  0x82   :  { %v29_v14 = vsel %vm16_vm0, %v141_v12, 0.0 }
  0x83   :  { %142 = vpow2.f32 %v27_v13  ;;  %30 = vadd.xlane.f32.xlu1 %v29_v14 }
  0x89   :  { %v215_v15 = vpop.eup %142 }
  0x8a   :  { %v32_v16 = vsel %vm16_vm0, %v215_v15, 0.0 }
  0x8b   :  { %33 = vadd.xlane.f32.xlu1 %v32_v16 }
  0xf6   :  { %v31_v17 = vpop.xlane.xlu1 %30 }
  0xf7   :  { %144 = vrcp.f32 %v31_v17  ;;  %v46_v28 = vand.u32 2147483648, %v31_v17  ;;  %vm40_vm2 = vweird.f32 %v31_v17  ;;  %v44_v31 = vand.u32 2147483647, %v31_v17 }
  0xf8   :  { %146 = vlog2.f32 %v31_v17 }
  0xf9   :  { %v47_v38 = vor.u32 1.1754944e-38, %v46_v28  ;;  %vm45_vm5 = vcmp.eq.f32.partialorder %v44_v31, 8.507059e+37 }
  0xfd   :  { %v145_v18 = vpop.eup %144 }
  0xfe   :  { %v147_v19 = vpop.eup %146  ;;  %v36_v20 = vmul.f32 %v145_v18, %v31_v17  ;;  %v34_v21 = vpop.xlane.xlu1 %33  ;;  %vm41_vm1 = vweird.f32 %v145_v18 }
  0xff   :  { %148 = vrcp.f32 %v34_v21  ;;  %v66_v22 = vmul.f32 0.6931472, %v147_v19  ;;  %vm42_vm3 = vmor %vm40_vm2, %vm41_vm1  ;;  %v61_v47 = vand.u32 2147483648, %v34_v21  ;;  %vm55_vm7 = vweird.f32 %v34_v21 }
 0x100   :  { %v37_v23 = vsub.f32 1.0, %v36_v20  ;;  %150 = vlog2.f32 %v34_v21  ;;  %v59_v50 = vand.u32 2147483647, %v34_v21 }
 0x101   :  { %v69_v25 = vsub.f32 %v23_v8, %v66_v22  ;;  %v62_v57 = vor.u32 1.1754944e-38, %v61_v47 }
 0x102   :  { %v38_v26 = vmul.f32 %v145_v18, %v37_v23  ;;  %vm60_vm9 = vcmp.eq.f32.partialorder %v59_v50, 8.507059e+37 }
 0x103   :  { %v71_v27 = vmul.f32 0.7, %v69_v25 }
 0x104   :  { %v39_v30 = vadd.f32 %v145_v18, %v38_v26 }
 0x105   :  { %v149_v32 = vpop.eup %148  ;;  %v73_v34 = vmul.f32 1.442695, %v71_v27 }
 0x106   :  { %v151_v35 = vpop.eup %150  ;;  %v51_v36 = vmul.f32 %v149_v32, %v34_v21  ;;  %v43_v37 = vsel %vm42_vm3, %v145_v18, %v39_v30  ;;  %vm56_vm6 = vweird.f32 %v149_v32 }
 0x107   :  { %152 = vpow2.f32 %v73_v34  ;;  %v68_v39 = vmul.f32 0.6931472, %v151_v35  ;;  %v48_v41 = vsel %vm45_vm5, %v47_v38, %v43_v37  ;;  %vm57_vm8 = vmor %vm55_vm7, %vm56_vm6 }
 0x108   :  { %v52_v40 = vsub.f32 1.0, %v51_v36  ;;  %v49_v48 = vmul.f32 %v141_v12, %v48_v41 }
 0x109   :  { %v70_v42 = vsub.f32 %v24_v11, %v68_v39 }
 0x10a   :  { %v53_v43 = vmul.f32 %v149_v32, %v52_v40 }
 0x10b   :  { %v72_v46 = vmul.f32 0.7, %v70_v42 }
 0x10c   :  { %v54_v49 = vadd.f32 %v149_v32, %v53_v43 }
 0x10d   :  { %v153_v51 = vpop.eup %152  ;;  %v75_v52 = vmul.f32 1.442695, %v72_v46 }
 0x10e   :  { %v91_v53 = vmul.f32 %v153_v51, %v89_v45  ;;  %v77_v54 = vmul.f32 %v153_v51, %v49_v48  ;;  %v58_v55 = vsel %vm57_vm8, %v149_v32, %v54_v49 }
 0x10f   :  { %154 = vpow2.f32 %v75_v52  ;;  %v63_v60 = vsel %vm60_vm9, %v62_v57, %v58_v55 }
 0x110   :  { %v93_v58 = vsel %vm16_vm0, %v91_v53, 0.0  ;;  %v99_v59 = vsel %vm16_vm0, %v77_v54, 0.0  ;;  %v64_v61 = vmul.f32 %v215_v15, %v63_v60 }
 0x111   :  { %94 = vadd.xlane.f32.xlu0 %v93_v58  ;;  %100 = vadd.xlane.f32.xlu2 %v99_v59 }
 0x115   :  { %v155_v62 = vpop.eup %154 }
 0x116   :  { %v92_v0 = vmul.f32 %v155_v62, %v90_v63  ;;  %v78_v1 = vmul.f32 %v155_v62, %v64_v61 }
 0x118   :  { %v96_v2 = vsel %vm16_vm0, %v92_v0, 0.0  ;;  %v102_v3 = vsel %vm16_vm0, %v78_v1, 0.0 }
 0x119   :  { %97 = vadd.xlane.f32.xlu1 %v96_v2  ;;  %103 = vadd.xlane.f32.xlu0 %v102_v3 }
 0x184   :  { %v95_v4 = vpop.xlane.xlu0 %94  ;;  %v101_v5 = vpop.xlane.xlu2 %100 }
 0x185   :  { %v107_v6 = vmul.f32 0.5882353, %v101_v5  ;;  %v105_v7 = vsub.f32 0.7704478, %v95_v4 }
 0x187   :  { %v109_v12 = vadd.f32 %v107_v6, %v105_v7 }
 0x18c   :  { %v98_v8 = vpop.xlane.xlu1 %97  ;;  %v104_v9 = vpop.xlane.xlu0 %103 }
 0x18d   :  { %v106_v10 = vsub.f32 0.7704478, %v98_v8  ;;  %v108_v11 = vmul.f32 0.5882353, %v104_v9 }
 0x18f   :  { %v110_v13 = vadd.f32 %v108_v11, %v106_v10 }
 0x191   :  { %v111_v14 = vadd.f32 %v110_v13, %v109_v12 }
 0x193   :  { %v112_v15 = vrot.slane %v111_v14, 4 }
 0x195   :  { %v113_v16 = vadd.f32 %v112_v15, %v111_v14 }
 0x197   :  { %v114_v17 = vrot.slane %v113_v16, 2 }
 0x199   :  { %v115_v18 = vadd.f32 %v114_v17, %v113_v16 }
 0x19b   :  { %v116_v19 = vrot.slane %v115_v18, 1 }
 0x19d   :  { %v117_v20 = vadd.f32 %v116_v19, %v115_v18 }
 0x19f   :  { %118 = vst [vmem:[#allocation2] sm:$0x1] %v117_v20 }
 0x1a0   :  { %129 = dma.vmem_to_hbm [thread:$0]  %s125_s1, 16, %s127_s19, [#allocation3]  }
 0x1a1   :  { %180 = dma.done.wait [#allocation3], 16  }
 0x1a2   :  { %181 = vsyncadd [#allocation3], 4294967280 }
 0x1a3   :  { %134 = vsyncpa [#allocation3], 1 }

</bundles_post_ra>
